<compile_context>
chip_gen: v7x
topology: tpu7x:2x2x1
jax: 0.10.0
libtpu: 0.0.40
codegen_flags: <defaults>
</compile_context>

<pallas_src>
import jax
import jax.numpy as jnp
from jax.experimental import pallas as pl
from jax.experimental.pallas import tpu as pltpu


def _divide_encode_kernel(x_ref, w_ref, o_ref):
    # x_ref: (TB, num_inputs), w_ref: (num_inputs, num_groups), o_ref: (TB, num_groups)
    o_ref[...] = jnp.dot(
        x_ref[...], w_ref[...], preferred_element_type=jnp.float32
    ).astype(o_ref.dtype)


def _block_diagonal_weight(weights):
    """W (G, P) -> w_bd (G*P, G) with w_bd[g*P + p, g] = W[g, p]."""
    num_groups, num_per_group = weights.shape
    eye_g = jnp.eye(num_groups, dtype=weights.dtype)                 # (G, G)
    w_bd = eye_g[:, None, :] * weights[:, :, None]                   # (G, P, G)
    return w_bd.reshape(num_groups * num_per_group, num_groups)      # (G*P, G)


def divide_encode(x, weights, num_per_group, *, block_b=2048):
    """x: (..., num_inputs); weights: (num_groups, num_per_group)."""
    num_inputs = x.shape[-1]
    assert num_inputs % num_per_group == 0
    num_groups = num_inputs // num_per_group

    # Lane-dense input: feature dim (num_inputs) stays on the last/lane axis.
    x2 = x.reshape((-1, num_inputs))
    batch = x2.shape[0]

    # Precompute block-diagonal weight once in the wrapper (resident in VMEM).
    w_bd = _block_diagonal_weight(weights)

    # Batch tile: multiple of 8 sublanes; conservative cap keeps double-buffered
    # x-tiles tiny (TB * 128 lanes * 4 B * 2 bufs ~= 2 MiB at TB=2048) so it is
    # safe under v7x's 64 MiB VMEM / 32 MiB scoped default as well as v5e/v6e.
    tb = min(block_b, max(batch, 1))
    tb = max(8, ((tb + 7) // 8) * 8)

    num_tiles = pl.cdiv(batch, tb)
    padded_b = num_tiles * tb
    if padded_b != batch:
        x2 = jnp.pad(x2, ((0, padded_b - batch), (0, 0)))

    out = pl.pallas_call(
        _divide_encode_kernel,
        out_shape=jax.ShapeDtypeStruct((padded_b, num_groups), x.dtype),
        grid=(num_tiles,),
        in_specs=[
            pl.BlockSpec((tb, num_inputs), lambda i: (i, 0)),
            pl.BlockSpec((num_inputs, num_groups), lambda i: (0, 0)),  # resident
        ],
        out_specs=pl.BlockSpec((tb, num_groups), lambda i: (i, 0)),
        compiler_params=pltpu.CompilerParams(
            dimension_semantics=("parallel",),
        ),
    )(x2, w_bd)

    return out[:batch]


def xavier_normal(key, shape, dtype=jnp.float32):
    # nn.init.xavier_normal_ for a 2D weight (fan_in = shape[1], fan_out = shape[0])
    fan_out, fan_in = shape
    std = (2.0 / (fan_in + fan_out)) ** 0.5
    return std * jax.random.normal(key, shape, dtype=dtype)


def _reference(x, weights, num_per_group):
    num_inputs = x.shape[-1]
    num_groups = num_inputs // num_per_group
    xr = x.reshape(-1, num_groups, num_per_group)
    return jnp.sum(xr * weights[None, :, :], axis=2)


if __name__ == "__main__":
    # Module config: num_inputs=32, num_per_group=8 -> num_groups=4
    num_inputs = 32
    num_per_group = 8
    num_groups = num_inputs // num_per_group
    batch = 2

    key = jax.random.PRNGKey(0)
    k_x, k_w, k_x2 = jax.random.split(key, 3)

    x = jax.random.normal(k_x, (batch, num_inputs), dtype=jnp.float32)
    weights = xavier_normal(k_w, (num_groups, num_per_group))

    out = divide_encode(x, weights, num_per_group)
    out = jax.block_until_ready(out)

    ref = _reference(x, weights, num_per_group)
    assert out.shape == (batch, num_groups)
    assert jnp.allclose(out, ref, atol=1e-5, rtol=1e-5)

    # Second run with a non-divisible batch and a small tile to exercise the
    # batch grid + tail-padding path.
    x_big = jax.random.normal(k_x2, (300, num_inputs), dtype=jnp.float32)
    out_big = jax.block_until_ready(
        divide_encode(x_big, weights, num_per_group, block_b=128)
    )
    ref_big = _reference(x_big, weights, num_per_group)
    assert out_big.shape == (300, num_groups)
    assert jnp.allclose(out_big, ref_big, atol=1e-5, rtol=1e-5)

    print("KERNEL_OK")
</pallas_src>

<mosaic_0001>
module attributes {stable_mosaic.version = 11 : i64} {
  func.func @_divide_encode_kernel(%arg0: i32, %arg1: memref<8x32xf32, #tpu.memory_space<vmem>>, %arg2: memref<32x4xf32, #tpu.memory_space<vmem>>, %arg3: memref<8x4xf32, #tpu.memory_space<vmem>>) attributes {dimension_semantics = [#tpu.dimension_semantics<parallel>], iteration_bounds = array<i64: 1>, scalar_prefetch = 0 : i64, scratch_operands = 0 : i64, tpu.core_type = #tpu.core_type<tc>, window_params = [{transform_indices = @transform_0, window_bounds = array<i64: 8, 32>}, {pipeline_mode = #tpu.pipeline_mode<synchronous>, transform_indices = @transform_1, window_bounds = array<i64: 32, 4>}, {transform_indices = @transform_2, window_bounds = array<i64: 8, 4>}]} {
    %c0 = arith.constant 0 : index
    %c0_0 = arith.constant 0 : index
    %0 = vector.load %arg1[%c0, %c0_0] : memref<8x32xf32, #tpu.memory_space<vmem>>, vector<8x32xf32>
    %c0_1 = arith.constant 0 : index
    %c0_2 = arith.constant 0 : index
    %1 = vector.load %arg2[%c0_1, %c0_2] : memref<32x4xf32, #tpu.memory_space<vmem>>, vector<32x4xf32>
    %cst = arith.constant dense<0.000000e+00> : vector<8x4xf32>
    %2 = tpu.matmul %0, %1, %cst {dimension_numbers = #tpu.dot_dimension_numbers<[1], [0], [0], [1], [0, 0, 1, 1], [], []>} : vector<8x32xf32>, vector<32x4xf32>, vector<8x4xf32> -> vector<8x4xf32>
    %c0_3 = arith.constant 0 : index
    %c0_4 = arith.constant 0 : index
    %3 = vector.load %arg3[%c0_3, %c0_4] : memref<8x4xf32, #tpu.memory_space<vmem>>, vector<8x4xf32>
    tpu.vector_store %arg3[%c0_3, %c0_4], %2 {strides = array<i32>} : memref<8x4xf32, #tpu.memory_space<vmem>>, vector<8x4xf32>,
    return
  }
  func.func @transform_0(%arg0: i32) -> (i32, i32) {
    %c0_i32 = arith.constant 0 : i32
    %c0_i32_0 = arith.constant 0 : i32
    return %arg0, %c0_i32 : i32, i32
  }
  func.func @transform_1(%arg0: i32) -> (i32, i32) {
    %c0_i32 = arith.constant 0 : i32
    %c0_i32_0 = arith.constant 0 : i32
    %c0_i32_1 = arith.constant 0 : i32
    return %c0_i32, %c0_i32_0 : i32, i32
  }
  func.func @transform_2(%arg0: i32) -> (i32, i32) {
    %c0_i32 = arith.constant 0 : i32
    %c0_i32_0 = arith.constant 0 : i32
    return %arg0, %c0_i32 : i32, i32
  }
}

</mosaic_0001>

<bundles_post_ra>
// kernel: tpu_custom_call.1
= control target key start
LH: loop header
LB: loop body
LE: loop exit
PB: predicated region body
PF: predicated region fallthrough
CT: control target
= control target key end

     0   :  { %v122_v0 = vmov 0.0|0.0   ;;  %vm123_vm0 = vmmov 0   ;;  %v124_v4 = vmov 0.0   ;;  %vm16_vm1 = vcmask 261120   ;;  %s158_s1 = inlined_call_operand.vmem [shape: f32[32,4], index: 1, kind: input, shape index: {}]   ;;  %s159_s0 = inlined_call_operand.vmem [shape: f32[8,32], index: 0, kind: input, shape index: {}]   ;;  %s160_s2 = inlined_call_operand.vmem [shape: f32[8,4], index: 2, kind: output, shape index: {}]  }
   0x1   :  { %113 = vmatprep.subr.bf16.mxu0 %v122_v0  ;;  %v12_v1 = vld [vmem:[%s158_s1] sm:$0xff]  ;;  %v13_v2 = vld [vmem:[%s158_s1 + $0x8] sm:$0xff]  ;;  %v14_v3 = vld [vmem:[%s158_s1 + $0x10] sm:$0xff]  ;;  %110 = vmatprep.mubr.msk.f32.mxu0 %vm123_vm0, %v124_v4  ;;  %vm90_vm2 = vcmask 31744  }
   0x2   :  { %v114_v5 = vpack.c.bf16 %v13_v2, %v12_v1  ;;  %v15_v6 = vld [vmem:[%s158_s1 + $0x18] sm:$0xff]  ;;  %v11_v8 = vld [vmem:[%s159_s0] sm:$0xff] }
   0x3   :  { %v117_v7 = vpack.c.bf16 %v15_v6, %v14_v3 }
   0x4   :  { %115 = vmatpush3.bf16.msra.mxu0 %v114_v5 }
   0x5   :  { %116 = vmatprep.subr.bf16.mxu0 %v122_v0 }
   0x8   :  { %118 = vmatpush3.bf16.msra.mxu0 %v117_v7 }
   0xb   :  { %111 = vmatmul.mubr.msk.f32.vlgmr.msra.gmra.mrb[0].mxu0 %vm16_vm1, %v11_v8 }
  0xde   :  { %v86_v9 = vpop.f32.mrb[0].mxu0 }
  0xdf   :  { %91 = vst.msk [vmem:[%s160_s2] sm:$0xff] %vm90_vm2, %v86_v9  ;;  %v112_v10 = vpop.f32.mrb[1].mxu0 }

</bundles_post_ra>
